<compile_context>
chip_gen: v5e
topology: v5e:2x2
jax: 0.10.0
libtpu: 0.0.40
codegen_flags: <defaults>
</compile_context>

<pallas_src>
import functools

import jax
import jax.numpy as jnp
from jax.experimental import pallas as pl
from jax.experimental.pallas import tpu as pltpu

LANE = 128            # lane width: pad hidden/output feature dims to this
SUBLANE = 8           # f32 sublane granularity: batch tiles are multiples of this
MAX_TILE_B = 512      # batch tile target (larger tiles amortize per-step overhead)
VMEM_TILE_BUDGET = 48 << 20   # conservative cross-gen budget (v7x physical = 64 MiB)


def _round_up(n, m):
    return (n + m - 1) // m * m


def _cdiv(n, m):
    return (n + m - 1) // m


def fcnet_kernel(x_ref, w1_ref, b1_ref, w2_ref, b2_ref, w3_ref, b3_ref, out_ref):
    """Fused y = relu(relu(x@W1+b1)@W2+b2)@W3 + b3 for one batch tile.

    MXU operands are bf16 (x cast in-kernel); accumulation and the bias+ReLU
    epilogue stay f32.
    """
    x = x_ref[...].astype(jnp.bfloat16)          # bf16 cast in-kernel (no extra HBM pass)

    # fc1 + ReLU
    h1 = jnp.dot(x, w1_ref[...], preferred_element_type=jnp.float32)
    h1 = jnp.maximum(h1 + b1_ref[...], 0.0)

    # fc2 + ReLU
    h2 = jnp.dot(h1.astype(jnp.bfloat16), w2_ref[...],
                 preferred_element_type=jnp.float32)
    h2 = jnp.maximum(h2 + b2_ref[...], 0.0)

    # fc3 (no activation)
    y = jnp.dot(h2.astype(jnp.bfloat16), w3_ref[...],
                preferred_element_type=jnp.float32)
    out_ref[...] = (y + b3_ref[...]).astype(out_ref.dtype)


def prepare_params(w1, b1, w2, b2, w3, b3):
    """One-time weight prep (hoisted out of the forward): pad to lane-aligned
    feature dims and cast weights to bf16; biases stay f32 for the epilogue.

    Zero padding keeps the math identical (padded h1/h2 columns are exactly 0
    after the f32 bias-add + ReLU, so padded w2/w3 rows contribute nothing).
    """
    in_size, hid = w1.shape
    out_size = w3.shape[1]
    hid_p = _round_up(hid, LANE)
    out_p = _round_up(out_size, LANE)

    def padw(w, rows, cols):
        w = w.astype(jnp.bfloat16)
        return jnp.pad(w, ((0, rows - w.shape[0]), (0, cols - w.shape[1])))

    def padb(b, cols):
        b = jnp.asarray(b, jnp.float32).reshape(1, -1)
        return jnp.pad(b, ((0, 0), (0, cols - b.shape[1])))

    # w1 keeps its unpadded K dim (block == full array dim satisfies the
    # (8,128) rule), so x needs no feature padding either.
    w1_p = padw(w1, in_size, hid_p)
    w2_p = padw(w2, hid_p, hid_p)
    w3_p = padw(w3, hid_p, out_p)
    return (w1_p, padb(b1, hid_p), w2_p, padb(b2, hid_p), w3_p, padb(b3, out_p))


@functools.partial(jax.jit, static_argnames=("out_size",))
def fcnet_forward(x, params, *, out_size):
    w1, b1, w2, b2, w3, b3 = params
    B, in_size = x.shape
    hid_p = w1.shape[1]
    out_p = w3.shape[1]

    # --- VMEM accounting (bytes) -------------------------------------------
    weight_bytes = ((w1.size + w2.size + w3.size) * 2          # bf16, single-buffered
                    + (b1.size + b2.size + b3.size) * 4)       # f32 biases

    def tile_bytes(tb):
        return (2 * tb * in_size * 4            # x tile, double-buffered, f32
                + 2 * tb * out_p * 4            # out tile, double-buffered, f32
                + tb * hid_p * (4 + 4 + 2 + 2)  # h1/h2 f32 + their bf16 casts
                + tb * out_p * 4)               # y f32 before store

    # --- Batch tile choice --------------------------------------------------
    # >= 2 grid steps whenever B >= 16 so v7x megacore ("parallel") shards the
    # batch axis across both TensorCores; otherwise tile up to MAX_TILE_B with
    # < 8 rows of dead padding; shrink only if VMEM would overflow.
    num_tiles = max(_cdiv(B, MAX_TILE_B), 2 if B >= 16 else 1)
    while True:
        tile_b = _round_up(_cdiv(B, num_tiles), SUBLANE)
        if weight_bytes + tile_bytes(tile_b) <= VMEM_TILE_BUDGET or tile_b <= SUBLANE:
            break
        num_tiles += 1
    # TODO(synk): if the resident weights alone exceed the ~48 MiB budget
    # (hid ~>= 4K on v7x), tile the hidden/output feature dims (grid over N
    # with an accumulator) instead of shrinking the batch tile.

    b_p = _round_up(B, tile_b)
    if b_p != B:
        # Only the batch axis is padded (features pass through untouched).
        x = jnp.pad(x, ((0, b_p - B), (0, 0)))
    grid = (b_p // tile_b,)

    vmem_limit = min(
        64 << 20,                                   # v7x physical per-TC VMEM
        max(32 << 20,
            int((weight_bytes + tile_bytes(tile_b)) * 1.25) + (1 << 20)))

    # Constant index_map -> never re-DMA'd; Buffered(1) avoids allocating a
    # useless second VMEM buffer per weight/bias operand.
    def resident(shape):
        return pl.BlockSpec(shape, lambda i: (0, 0), pipeline_mode=pl.Buffered(1))

    flops = 2 * b_p * (in_size * hid_p + hid_p * hid_p + hid_p * out_p)
    bytes_accessed = (b_p * in_size * 4          # f32 x in
                      + weight_bytes             # resident weights/biases
                      + b_p * out_p * 4)         # f32 out

    out_padded = pl.pallas_call(
        fcnet_kernel,
        out_shape=jax.ShapeDtypeStruct((b_p, out_p), jnp.float32),
        grid=grid,
        in_specs=[
            pl.BlockSpec((tile_b, in_size), lambda i: (i, 0)),  # x: batch-streamed, f32
            resident((in_size, hid_p)),                         # w1 (VMEM-resident, bf16)
            resident((1, hid_p)),                               # b1 (f32)
            resident((hid_p, hid_p)),                           # w2
            resident((1, hid_p)),                               # b2
            resident((hid_p, out_p)),                           # w3
            resident((1, out_p)),                               # b3
        ],
        out_specs=pl.BlockSpec((tile_b, out_p), lambda i: (i, 0)),
        compiler_params=pltpu.CompilerParams(
            dimension_semantics=("parallel",),                  # shard batch over TCs
            vmem_limit_bytes=vmem_limit),
        cost_estimate=pl.CostEstimate(
            flops=flops, transcendentals=0, bytes_accessed=bytes_accessed),
    )(x, w1, b1, w2, b2, w3, b3)

    # Slice away batch / lane padding.
    return out_padded[:B, :out_size]


def init_params(key, input_size, hidden_size, output_size):
    # Deterministic init mimicking PyTorch nn.Linear default:
    # U(-1/sqrt(fan_in), 1/sqrt(fan_in)) for both weight and bias.
    def linear(key, fan_in, fan_out):
        kw, kb = jax.random.split(key)
        bound = 1.0 / jnp.sqrt(fan_in)
        w = jax.random.uniform(kw, (fan_in, fan_out), jnp.float32, -bound, bound)
        b = jax.random.uniform(kb, (1, fan_out), jnp.float32, -bound, bound)
        return w, b

    k1, k2, k3 = jax.random.split(key, 3)
    w1, b1 = linear(k1, input_size, hidden_size)
    w2, b2 = linear(k2, hidden_size, hidden_size)
    w3, b3 = linear(k3, hidden_size, output_size)
    return w1, b1, w2, b2, w3, b3


if __name__ == "__main__":
    input_size, hidden_size, output_size = 16, 32, 8
    batch = 2

    key = jax.random.PRNGKey(0)
    kx, kp = jax.random.split(key)
    x = jax.random.normal(kx, (batch, input_size), jnp.float32)
    w1, b1, w2, b2, w3, b3 = init_params(kp, input_size, hidden_size, output_size)

    # One-time parameter prep (pad + bf16 cast), outside the forward path.
    params = jax.block_until_ready(prepare_params(w1, b1, w2, b2, w3, b3))

    out = jax.block_until_ready(fcnet_forward(x, params, out_size=output_size))

    # Reference with the same bf16 MXU operands / f32 accumulation as the kernel.
    def mm(a, w):
        return jnp.dot(a.astype(jnp.bfloat16), w.astype(jnp.bfloat16),
                       preferred_element_type=jnp.float32)

    h = jnp.maximum(mm(x, w1) + b1, 0.0)
    h = jnp.maximum(mm(h, w2) + b2, 0.0)
    ref_bf16 = mm(h, w3) + b3

    # Full-f32 reference (forward-pass semantics of the PyTorch module).
    h32 = jnp.maximum(x @ w1 + b1, 0.0)
    h32 = jnp.maximum(h32 @ w2 + b2, 0.0)
    ref_f32 = h32 @ w3 + b3

    assert out.shape == (batch, output_size)
    assert jnp.allclose(out, ref_bf16, atol=1e-4, rtol=1e-4)
    assert jnp.allclose(out, ref_f32, atol=1e-1, rtol=5e-2)

    print("KERNEL_OK")
</pallas_src>

<mosaic_0001>
module attributes {stable_mosaic.version = 11 : i64} {
  func.func @fcnet_kernel(%arg0: i32, %arg1: memref<8x16xf32, #tpu.memory_space<vmem>>, %arg2: memref<16x128xbf16, #tpu.memory_space<vmem>>, %arg3: memref<1x128xf32, #tpu.memory_space<vmem>>, %arg4: memref<128x128xbf16, #tpu.memory_space<vmem>>, %arg5: memref<1x128xf32, #tpu.memory_space<vmem>>, %arg6: memref<128x128xbf16, #tpu.memory_space<vmem>>, %arg7: memref<1x128xf32, #tpu.memory_space<vmem>>, %arg8: memref<8x128xf32, #tpu.memory_space<vmem>>) attributes {dimension_semantics = [#tpu.dimension_semantics<parallel>], iteration_bounds = array<i64: 1>, scalar_prefetch = 0 : i64, scratch_operands = 0 : i64, tpu.core_type = #tpu.core_type<tc>, window_params = [{transform_indices = @transform_0, window_bounds = array<i64: 8, 16>}, {pipeline_mode = #tpu.pipeline_mode<synchronous>, transform_indices = @transform_1, window_bounds = array<i64: 16, 128>}, {pipeline_mode = #tpu.pipeline_mode<synchronous>, transform_indices = @transform_2, window_bounds = array<i64: 1, 128>}, {pipeline_mode = #tpu.pipeline_mode<synchronous>, transform_indices = @transform_3, window_bounds = array<i64: 128, 128>}, {pipeline_mode = #tpu.pipeline_mode<synchronous>, transform_indices = @transform_4, window_bounds = array<i64: 1, 128>}, {pipeline_mode = #tpu.pipeline_mode<synchronous>, transform_indices = @transform_5, window_bounds = array<i64: 128, 128>}, {pipeline_mode = #tpu.pipeline_mode<synchronous>, transform_indices = @transform_6, window_bounds = array<i64: 1, 128>}, {transform_indices = @transform_7, window_bounds = array<i64: 8, 128>}]} {
    %c0 = arith.constant 0 : index
    %c0_0 = arith.constant 0 : index
    %0 = vector.load %arg1[%c0, %c0_0] : memref<8x16xf32, #tpu.memory_space<vmem>>, vector<8x16xf32>
    %1 = arith.truncf %0 : vector<8x16xf32> to vector<8x16xbf16>
    %c0_1 = arith.constant 0 : index
    %c0_2 = arith.constant 0 : index
    %2 = vector.load %arg2[%c0_1, %c0_2] : memref<16x128xbf16, #tpu.memory_space<vmem>>, vector<16x128xbf16>
    %cst = arith.constant dense<0.000000e+00> : vector<8x128xf32>
    %3 = tpu.matmul %1, %2, %cst {dimension_numbers = #tpu.dot_dimension_numbers<[1], [0], [0], [1], [0, 0, 1, 1], [], []>} : vector<8x16xbf16>, vector<16x128xbf16>, vector<8x128xf32> -> vector<8x128xf32>
    %c0_3 = arith.constant 0 : index
    %c0_4 = arith.constant 0 : index
    %4 = vector.load %arg3[%c0_3, %c0_4] : memref<1x128xf32, #tpu.memory_space<vmem>>, vector<1x128xf32>
    %5 = vector.broadcast %4 : vector<1x128xf32> to vector<8x128xf32>
    %6 = arith.addf %3, %5 : vector<8x128xf32>
    %cst_5 = arith.constant 0.000000e+00 : f32
    %7 = vector.broadcast %cst_5 : f32 to vector<8x128xf32>
    %8 = arith.maximumf %6, %7 : vector<8x128xf32>
    %9 = arith.truncf %8 : vector<8x128xf32> to vector<8x128xbf16>
    %c0_6 = arith.constant 0 : index
    %c0_7 = arith.constant 0 : index
    %10 = vector.load %arg4[%c0_6, %c0_7] : memref<128x128xbf16, #tpu.memory_space<vmem>>, vector<128x128xbf16>
    %cst_8 = arith.constant dense<0.000000e+00> : vector<8x128xf32>
    %11 = tpu.matmul %9, %10, %cst_8 {dimension_numbers = #tpu.dot_dimension_numbers<[1], [0], [0], [1], [0, 0, 1, 1], [], []>} : vector<8x128xbf16>, vector<128x128xbf16>, vector<8x128xf32> -> vector<8x128xf32>
    %c0_9 = arith.constant 0 : index
    %c0_10 = arith.constant 0 : index
    %12 = vector.load %arg5[%c0_9, %c0_10] : memref<1x128xf32, #tpu.memory_space<vmem>>, vector<1x128xf32>
    %13 = vector.broadcast %12 : vector<1x128xf32> to vector<8x128xf32>
    %14 = arith.addf %11, %13 : vector<8x128xf32>
    %cst_11 = arith.constant 0.000000e+00 : f32
    %15 = vector.broadcast %cst_11 : f32 to vector<8x128xf32>
    %16 = arith.maximumf %14, %15 : vector<8x128xf32>
    %17 = arith.truncf %16 : vector<8x128xf32> to vector<8x128xbf16>
    %c0_12 = arith.constant 0 : index
    %c0_13 = arith.constant 0 : index
    %18 = vector.load %arg6[%c0_12, %c0_13] : memref<128x128xbf16, #tpu.memory_space<vmem>>, vector<128x128xbf16>
    %cst_14 = arith.constant dense<0.000000e+00> : vector<8x128xf32>
    %19 = tpu.matmul %17, %18, %cst_14 {dimension_numbers = #tpu.dot_dimension_numbers<[1], [0], [0], [1], [0, 0, 1, 1], [], []>} : vector<8x128xbf16>, vector<128x128xbf16>, vector<8x128xf32> -> vector<8x128xf32>
    %c0_15 = arith.constant 0 : index
    %c0_16 = arith.constant 0 : index
    %20 = vector.load %arg7[%c0_15, %c0_16] : memref<1x128xf32, #tpu.memory_space<vmem>>, vector<1x128xf32>
    %21 = vector.broadcast %20 : vector<1x128xf32> to vector<8x128xf32>
    %22 = arith.addf %19, %21 : vector<8x128xf32>
    %c0_17 = arith.constant 0 : index
    %c0_18 = arith.constant 0 : index
    %23 = vector.load %arg8[%c0_17, %c0_18] : memref<8x128xf32, #tpu.memory_space<vmem>>, vector<8x128xf32>
    tpu.vector_store %arg8[%c0_17, %c0_18], %22 {strides = array<i32>} : memref<8x128xf32, #tpu.memory_space<vmem>>, vector<8x128xf32>,
    return
  }
  func.func @transform_0(%arg0: i32) -> (i32, i32) {
    %c0_i32 = arith.constant 0 : i32
    %c0_i32_0 = arith.constant 0 : i32
    return %arg0, %c0_i32 : i32, i32
  }
  func.func @transform_1(%arg0: i32) -> (i32, i32) {
    %c0_i32 = arith.constant 0 : i32
    %c0_i32_0 = arith.constant 0 : i32
    %c0_i32_1 = arith.constant 0 : i32
    return %c0_i32, %c0_i32_0 : i32, i32
  }
  func.func @transform_2(%arg0: i32) -> (i32, i32) {
    %c0_i32 = arith.constant 0 : i32
    %c0_i32_0 = arith.constant 0 : i32
    %c0_i32_1 = arith.constant 0 : i32
    return %c0_i32, %c0_i32_0 : i32, i32
  }
  func.func @transform_3(%arg0: i32) -> (i32, i32) {
    %c0_i32 = arith.constant 0 : i32
    %c0_i32_0 = arith.constant 0 : i32
    %c0_i32_1 = arith.constant 0 : i32
    return %c0_i32, %c0_i32_0 : i32, i32
  }
  func.func @transform_4(%arg0: i32) -> (i32, i32) {
    %c0_i32 = arith.constant 0 : i32
    %c0_i32_0 = arith.constant 0 : i32
    %c0_i32_1 = arith.constant 0 : i32
    return %c0_i32, %c0_i32_0 : i32, i32
  }
  func.func @transform_5(%arg0: i32) -> (i32, i32) {
    %c0_i32 = arith.constant 0 : i32
    %c0_i32_0 = arith.constant 0 : i32
    %c0_i32_1 = arith.constant 0 : i32
    return %c0_i32, %c0_i32_0 : i32, i32
  }
  func.func @transform_6(%arg0: i32) -> (i32, i32) {
    %c0_i32 = arith.constant 0 : i32
    %c0_i32_0 = arith.constant 0 : i32
    %c0_i32_1 = arith.constant 0 : i32
    return %c0_i32, %c0_i32_0 : i32, i32
  }
  func.func @transform_7(%arg0: i32) -> (i32, i32) {
    %c0_i32 = arith.constant 0 : i32
    %c0_i32_0 = arith.constant 0 : i32
    return %arg0, %c0_i32 : i32, i32
  }
}

</mosaic_0001>

<bundles_post_ra>
// kernel: fcnet_forward.1
= control target key start
LH: loop header
LB: loop body
LE: loop exit
PB: predicated region body
PF: predicated region fallthrough
CT: control target
= control target key end

     0   :  { %12 = vsyncpa [#allocation3], 0  ;;  %s476_s0 = inlined_call_operand.vmem [shape: f32[8,16], index: 0, kind: input, shape index: {}]   ;;  %s477_s1 = inlined_call_operand.vmem [shape: bf16[16,128], index: 1, kind: input, shape index: {}]   ;;  %s478_s2 = inlined_call_operand.vmem [shape: f32[1,128], index: 2, kind: input, shape index: {}]   ;;  %s479_s3 = inlined_call_operand.hbm [shape: bf16[128,128], index: 3, kind: input, shape index: {}]   ;;  %s480_s4 = inlined_call_operand.vmem [shape: f32[1,128], index: 4, kind: input, shape index: {}]   ;;  %s481_s5 = inlined_call_operand.hbm [shape: bf16[128,128], index: 5, kind: input, shape index: {}]   ;;  %s482_s6 = inlined_call_operand.vmem [shape: f32[1,128], index: 6, kind: input, shape index: {}]   ;;  %s483_s7 = inlined_call_operand.vmem [shape: f32[8,128], index: 7, kind: output, shape index: {}]  }
   0x1   :  { %s24_s26 = sshll.u32 %s479_s3, 4  ;;  %s25_s26 = int_to_ptr.hbm [resolvable:$true] %s24_s26 }
   0x2   :  { %13 = vsyncpa [#allocation5], 0  ;;  %s408_s27 = smov [#allocation2]   ;;  %s39_s8 = sshll.u32 %s481_s5, 4  ;;  %s40_s8 = int_to_ptr.hbm [resolvable:$true] %s39_s8 }
   0x3   :  { %s26_s28 = sshll.u32 %s408_s27, 4  ;;  %s409_s9 = smov 64   ;;  %s27_s28 = int_to_ptr.vmem [resolvable:$true] %s26_s28 }
   0x4   :  { %s410_s10 = smov 4   ;;  %s411_s11 = smov [#allocation4]  }
   0x5   :  { %32 = dma.hbm_to_vmem [thread:$0]  %s25_s26, 1024, %s27_s28, [#allocation3], %s409_s9, %s409_s9, %s410_s10  }
   0x6   :  { %s41_s12 = sshll.u32 %s411_s11, 4  ;;  %s42_s12 = int_to_ptr.vmem [resolvable:$true] %s41_s12 }
   0x7   :  { %47 = dma.hbm_to_vmem [thread:$0]  %s40_s8, 1024, %s42_s12, [#allocation5], %s409_s9, %s409_s9, %s410_s10  }
   0x8   :  { %404 = dma.done.wait [#allocation3], 1024  }
   0x9   :  { %405 = vsyncadd [#allocation3], 4294966272 }
   0xa   :  { %406 = dma.done.wait [#allocation5], 1024  }
   0xb   :  { %407 = vsyncadd [#allocation5], 4294966272  ;;  %v332_v0 = vld [vmem:[%s477_s1] sm:$0xff]  ;;  %v340_v2 = vld [vmem:[#allocation2 + $0x38] sm:$0xff]  ;;  %vm73_vm0 = vcmask 130048  }
   0xc   :  { %v59_v1 = vld [vmem:[%s476_s0] sm:$0xff]  ;;  %84 = vmatpush.bf16.msra.mxu0 %v332_v0  ;;  %160 = vmatpush.bf16.msra.mxu1 %v340_v2  ;;  %v339_v4 = vld [vmem:[#allocation2 + $0x30] sm:$0xff]  ;;  %v338_v5 = vld [vmem:[#allocation2 + $0x28] sm:$0xff] }
   0xd   :  { %v60_v3 = vpack.c.bf16 %v59_v1, %v59_v1  ;;  %v337_v6 = vld [vmem:[#allocation2 + $0x20] sm:$0xff]  ;;  %v336_v7 = vld [vmem:[#allocation2 + $0x18] sm:$0xff]  ;;  %v335_v8 = vld [vmem:[#allocation2 + $0x10] sm:$0xff] }
   0xe   :  { %v334_v9 = vld [vmem:[#allocation2 + $0x8] sm:$0xff]  ;;  %v333_v10 = vld [vmem:[#allocation2] sm:$0xff]  ;;  %v348_v11 = vld [vmem:[#allocation4 + $0x38] sm:$0xff] }
   0xf   :  { %267 = vmatmul.msk.bf16.vlgmr.msra.gmra.mxu0 %vm73_vm0, %v60_v3  ;;  %243 = vmatpush.bf16.msra.mxu2 %v348_v11  ;;  %v347_v12 = vld [vmem:[#allocation4 + $0x30] sm:$0xff]  ;;  %v346_v13 = vld [vmem:[#allocation4 + $0x28] sm:$0xff]  ;;  %v345_v14 = vld [vmem:[#allocation4 + $0x20] sm:$0xff] }
  0x10   :  { %161 = vmatpush.bf16.msra.mxu1 %v339_v4  ;;  %v344_v15 = vld [vmem:[#allocation4 + $0x18] sm:$0xff]  ;;  %v343_v16 = vld [vmem:[#allocation4 + $0x10] sm:$0xff]  ;;  %v353_v17 = vld [vmem:[%s478_s2] ss:$0 sm:$0xff] }
  0x11   :  { %v342_v23 = vld [vmem:[#allocation4 + $0x8] sm:$0xff]  ;;  %v341_v24 = vld [vmem:[#allocation4] sm:$0xff] }
  0x12   :  { %v354_v25 = vld [vmem:[%s480_s4] ss:$0 sm:$0xff] }
  0x13   :  { %244 = vmatpush.bf16.msra.mxu2 %v347_v12  ;;  %v355_v31 = vld [vmem:[%s482_s6] ss:$0 sm:$0xff] }
  0x14   :  { %162 = vmatpush.bf16.msra.mxu1 %v338_v5 }
  0x17   :  { %245 = vmatpush.bf16.msra.mxu2 %v346_v13 }
  0x18   :  { %163 = vmatpush.bf16.msra.mxu1 %v337_v6 }
  0x1b   :  { %246 = vmatpush.bf16.msra.mxu2 %v345_v14 }
  0x1c   :  { %164 = vmatpush.bf16.msra.mxu1 %v336_v7 }
  0x1f   :  { %247 = vmatpush.bf16.msra.mxu2 %v344_v15 }
  0x20   :  { %165 = vmatpush.bf16.msra.mxu1 %v335_v8 }
  0x23   :  { %248 = vmatpush.bf16.msra.mxu2 %v343_v16 }
  0x24   :  { %166 = vmatpush.bf16.msra.mxu1 %v334_v9 }
  0x27   :  { %249 = vmatpush.bf16.msra.mxu2 %v342_v23 }
  0x28   :  { %167 = vmatpush.bf16.msra.mxu1 %v333_v10 }
  0x2b   :  { %250 = vmatpush.bf16.msra.mxu2 %v341_v24 }
  0x8c   :  { %v86_v18 = vpop.f32.mrf.mxu0 }
  0x8d   :  { %v87_v19 = vadd.f32 %v353_v17, %v86_v18 }
  0x8f   :  { %v90_v20 = vmax.f32 %v87_v19, 0.0 }
  0x91   :  { %v91_v21 = vpack.c.bf16 %v90_v20, %v90_v20 }
  0x93   :  { %168 = vmatmul.bf16.vlgmr.msra.gmra.mxu1 %v91_v21 }
  0x94   :  { %v88_v22 = vpop.f32.mrf.mxu0 }
 0x110   :  { %v169_v26 = vpop.f32.mrf.mxu1 }
 0x111   :  { %v170_v27 = vadd.f32 %v354_v25, %v169_v26 }
 0x113   :  { %v173_v28 = vmax.f32 %v170_v27, 0.0 }
 0x115   :  { %v174_v29 = vpack.c.bf16 %v173_v28, %v173_v28 }
 0x117   :  { %251 = vmatmul.bf16.vlgmr.msra.gmra.mxu2 %v174_v29 }
 0x118   :  { %v171_v30 = vpop.f32.mrf.mxu1 }
 0x19a   :  { %v252_v32 = vpop.f32.mrf.mxu2 }
 0x19b   :  { %v253_v33 = vadd.f32 %v355_v31, %v252_v32 }
 0x19d   :  { %256 = vst [vmem:[%s483_s7] sm:$0xff] %v253_v33 }
 0x1a2   :  { %v254_v34 = vpop.f32.mrf.mxu2 }
 0x1a3   :  { %261 = vsyncpa [#allocation3], 1 }
 0x1a4   :  { %262 = vsyncpa [#allocation5], 1 }

</bundles_post_ra>
